<compile_context>
chip_gen: v6e
topology: v6e:2x2x1
jax: 0.10.0
libtpu: 0.0.40
codegen_flags: <defaults>
</compile_context>

<pallas_src>
import jax
import jax.numpy as jnp
from jax.experimental import pallas as pl
from jax.experimental.pallas import tpu as pltpu


def _perceptron_kernel(x_ref,    # (B, D+1)  flattened input with ones column
                       w_ref,    # (D+1, 3)  [W^T ; b] — bias folded in
                       o_ref):   # (B, 3)    softmax probabilities
    # logits = x_aug @ [W^T ; b]  (bias already folded into the matmul)
    logits = jnp.dot(x_ref[...], w_ref[...],
                     preferred_element_type=jnp.float32)

    # Softmax(dim=1), numerically stable, exact divide (approx reciprocal
    # removed — it gained nothing here and cost ~2e-3 of row-sum accuracy).
    m = jnp.max(logits, axis=1, keepdims=True)
    e = jnp.exp(logits - m)
    o_ref[...] = e / jnp.sum(e, axis=1, keepdims=True)


def perceptron_forward(x_btd, params):
    """x_btd: (B, seq_len, 6) float32 — same layout the PyTorch module sees."""
    B = x_btd.shape[0]
    D = x_btd.shape[1] * x_btd.shape[2]

    # x.contiguous().view(batch_size, -1) -> pure reshape; then append a ones
    # column so the bias rides inside the single matmul (one fewer kernel input).
    x_flat = x_btd.reshape(B, D).astype(jnp.float32)
    ones = jnp.ones((B, 1), jnp.float32)
    x_aug = jnp.concatenate([x_flat, ones], axis=1)          # (B, D+1)

    vmem = pl.BlockSpec(memory_space=pltpu.MemorySpace.VMEM)
    out = pl.pallas_call(
        _perceptron_kernel,
        out_shape=jax.ShapeDtypeStruct((B, 3), jnp.float32),
        in_specs=[vmem, vmem],
        out_specs=vmem,
    )(x_aug, params["w_aug"])
    return out


def init_params(key, seq_len=8, d_feat=6, n_out=3):
    """PyTorch nn.Linear default init: U(-1/sqrt(fan_in), 1/sqrt(fan_in))."""
    D = seq_len * d_feat
    bound = 1.0 / jnp.sqrt(jnp.float32(D))
    k_w, k_b = jax.random.split(key)
    w = jax.random.uniform(k_w, (n_out, D), jnp.float32, -bound, bound)
    b = jax.random.uniform(k_b, (n_out,), jnp.float32, -bound, bound)
    # Bias folded into the weight matrix: [W^T ; b] of shape (D+1, n_out).
    w_aug = jnp.concatenate([w.T, b.reshape(1, n_out)], axis=0)
    return {
        "w_aug": w_aug,             # (D+1, 3)
        "w": w,                     # kept for the pure-JAX reference
        "b": b,
    }


if __name__ == "__main__":
    key = jax.random.PRNGKey(0)
    k_x, k_p = jax.random.split(key)

    B, T, F = 2, 8, 6          # batch=2, seq_len=8, 6 features per step
    x = jax.random.normal(k_x, (B, T, F), jnp.float32)
    params = init_params(k_p, seq_len=T, d_feat=F, n_out=3)

    probs = perceptron_forward(x, params)
    probs = jax.block_until_ready(probs)

    # Pure-JAX reference (same math as the PyTorch module).
    ref_logits = x.reshape(B, -1) @ params["w"].T + params["b"]
    ref = jax.nn.softmax(ref_logits, axis=1)

    assert probs.shape == (B, 3)
    assert bool(jnp.all(jnp.isfinite(probs)))
    # Exact divide in the softmax -> tight tolerances again.
    assert bool(jnp.all(jnp.abs(jnp.sum(probs, axis=1) - 1.0) < 1e-5))
    assert bool(jnp.allclose(probs, ref, atol=1e-5, rtol=1e-5))
    print("KERNEL_OK")
</pallas_src>

<mosaic_0001>
module attributes {stable_mosaic.version = 11 : i64} {
  func.func @_perceptron_kernel(%arg0: memref<2x49xf32, #tpu.memory_space<vmem>>, %arg1: memref<49x3xf32, #tpu.memory_space<vmem>>, %arg2: memref<2x3xf32, #tpu.memory_space<vmem>>) attributes {dimension_semantics = [], scalar_prefetch = 0 : i64, scratch_operands = 0 : i64, tpu.core_type = #tpu.core_type<tc>} {
    %c0 = arith.constant 0 : index
    %c0_0 = arith.constant 0 : index
    %0 = vector.load %arg0[%c0, %c0_0] : memref<2x49xf32, #tpu.memory_space<vmem>>, vector<2x49xf32>
    %c0_1 = arith.constant 0 : index
    %c0_2 = arith.constant 0 : index
    %1 = vector.load %arg1[%c0_1, %c0_2] : memref<49x3xf32, #tpu.memory_space<vmem>>, vector<49x3xf32>
    %cst = arith.constant dense<0.000000e+00> : vector<2x3xf32>
    %2 = tpu.matmul %0, %1, %cst {dimension_numbers = #tpu.dot_dimension_numbers<[1], [0], [0], [1], [0, 0, 1, 1], [], []>} : vector<2x49xf32>, vector<49x3xf32>, vector<2x3xf32> -> vector<2x3xf32>
    %cst_3 = arith.constant dense<0xFF800000> : vector<2xf32>
    %3 = vector.multi_reduction <maximumf>, %2, %cst_3 [1] : vector<2x3xf32> to vector<2xf32>
    %4 = vector.shape_cast %3 : vector<2xf32> to vector<2x1xf32>
    %5 = vector.broadcast %4 : vector<2x1xf32> to vector<2x3xf32>
    %6 = arith.subf %2, %5 : vector<2x3xf32>
    %7 = math.exp %6 : vector<2x3xf32>
    %cst_4 = arith.constant dense<0.000000e+00> : vector<2xf32>
    %8 = vector.multi_reduction <add>, %7, %cst_4 [1] : vector<2x3xf32> to vector<2xf32>
    %9 = vector.shape_cast %8 : vector<2xf32> to vector<2x1xf32>
    %10 = vector.broadcast %9 : vector<2x1xf32> to vector<2x3xf32>
    %11 = arith.divf %7, %10 : vector<2x3xf32>
    %c0_5 = arith.constant 0 : index
    %c0_6 = arith.constant 0 : index
    %12 = vector.load %arg2[%c0_5, %c0_6] : memref<2x3xf32, #tpu.memory_space<vmem>>, vector<2x3xf32>
    tpu.vector_store %arg2[%c0_5, %c0_6], %11 {strides = array<i32>} : memref<2x3xf32, #tpu.memory_space<vmem>>, vector<2x3xf32>,
    return
  }
}

</mosaic_0001>

<bundles_post_ra>
// kernel: tpu_custom_call.1
= control target key start
LH: loop header
LB: loop body
LE: loop exit
PB: predicated region body
PF: predicated region fallthrough
CT: control target
= control target key end

     0   :  { %vm24_vm0 = vcmask 1040384   ;;  %v181_v1 = vmov 0.0   ;;  %vm182_vm1 = vmmov 0   ;;  %s229_s0 = inlined_call_operand.vmem [shape: f32[2,49], index: 0, kind: input, shape index: {}]   ;;  %s230_s1 = inlined_call_operand.vmem [shape: f32[49,3], index: 1, kind: input, shape index: {}]   ;;  %s231_s2 = inlined_call_operand.hbm [shape: f32[2,3], index: 2, kind: output, shape index: {}]  }
   0x1   :  { %v19_v0 = vld [vmem:[%s230_s1 + $0x30] sm:$0x1]  ;;  %135 = vmatprep.subr.mxu0 %v181_v1  ;;  %v18_v2 = vld [vmem:[%s230_s1 + $0x28] sm:$0xff]  ;;  %149 = vmatprep.mubr.msk.f32.mxu0 %vm182_vm1, %v181_v1 }
   0x2   :  { %136 = vmatpush3.msk.msra.mxu0 %vm24_vm0, %v19_v0 }
   0x3   :  { %7 = vsyncpa [#allocation3], 0  ;;  %137 = vmatprep.subr.mxu0 %v181_v1  ;;  %v17_v3 = vld [vmem:[%s230_s1 + $0x20] sm:$0xff]  ;;  %v16_v4 = vld [vmem:[%s230_s1 + $0x18] sm:$0xff]  ;;  %vm20_vm2 = vcmask 400384   ;;  %vm98_vm3 = vcmask 17408  }
   0x4   :  { %138 = vmatpush3.msra.mxu0 %v18_v2  ;;  %v15_v5 = vld [vmem:[%s230_s1 + $0x10] sm:$0xff]  ;;  %v14_v6 = vld [vmem:[%s230_s1 + $0x8] sm:$0xff]  ;;  %v13_v7 = vld [vmem:[%s230_s1] sm:$0xff] }
   0x5   :  { %139 = vmatprep.subr.mxu0 %v181_v1  ;;  %v12_v8 = vld [vmem:[%s229_s0] sm:$0x3]  ;;  %s183_s0 = smov [#allocation2]  }
   0x6   :  { %140 = vmatpush3.msra.mxu0 %v17_v3  ;;  %s117_s1 = sshll.u32 %s183_s0, 4  ;;  %s118_s1 = int_to_ptr.vmem [resolvable:$true] %s117_s1 }
   0x7   :  { %141 = vmatprep.subr.mxu0 %v181_v1  ;;  %s159_s25 = scalar_lea.vmem %s118_s1, 32  ;;  %p164_p1 = scmp.lt.s32.totalorder %s118_s1, %s118_s1 }
   0x8   :  { %142 = vmatpush3.msra.mxu0 %v16_v4  ;;  %p160_p0 = scmp.ne.s32.totalorder %s118_s1, %s159_s25  ;;  %p165_p2 = scmp.lt.s32.totalorder %s159_s25, %s159_s25 }
   0x9   :  { %143 = vmatprep.subr.mxu0 %v181_v1 }
   0xa   :  { %144 = vmatpush3.msra.mxu0 %v15_v5  ;;  %p166_p3 = por %p165_p2, %p164_p1 }
   0xb   :  { %145 = vmatprep.subr.mxu0 %v181_v1 }
   0xc   :  { %146 = vmatpush3.msra.mxu0 %v14_v6  ;;  %p167_p4 = pnand %p166_p3, %p160_p0 }
   0xd   :  { %147 = vmatprep.subr.mxu0 %v181_v1 }
   0xe   :  { %148 = vmatpush3.msra.mxu0 %v13_v7 }
   0xf   :  { %150 = vmatmul.mubr.msk.f32.vlgmr.msra.gmra.mxu0 %vm20_vm2, %v12_v8 }
  0xcf   :  { %v94_v9 = vpop.f32.mrf.mxu0 }
  0xd0   :  { %v99_v10 = vsel %vm98_vm3, %v94_v9, -inf }
  0xd1   :  { %100 = vmax.xlane.f32.xlu0 %v99_v10  ;;  %v151_v11 = vpop.f32.mrf.mxu0 }
 0x15a   :  { %v101_v12 = vpop.xlane.xlu0 %100 }
 0x15b   :  { %v102_v13 = vsub.f32 %v94_v9, %v101_v12 }
 0x15d   :  { %v103_v14 = vmul.f32 1.442695, %v102_v13 }
 0x15f   :  { %155 = vpow2.f32 %v103_v14 }
 0x16c   :  { %v156_v15 = vpop.eup %155 }
 0x16d   :  { %v105_v16 = vsel %vm98_vm3, %v156_v15, 0.0 }
 0x16e   :  { %106 = vadd.xlane.f32.xlu0 %v105_v16 }
 0x1f7   :  { %v107_v17 = vpop.xlane.xlu0 %106 }
 0x1f8   :  { %157 = vrcp.f32 %v107_v17 }
 0x205   :  { %v158_v18 = vpop.eup %157 }
 0x206   :  { %v109_v19 = vmul.f32 %v158_v18, %v156_v15 }
 0x208   :  { %110 = vst.msk [vmem:[#allocation2] sm:$0x3] %vm98_vm3, %v109_v19 }
 0x209   :  { %170 = shalt.err (!%p167_p4)
}
 0x20a   :  { %120 = dma.vmem_to_hbm [thread:$0]  %s118_s1, 32, %s231_s2, [#allocation3]  }
 0x20b   :  { %179 = dma.done.wait [#allocation3], 32  }
 0x20c   :  { %180 = vsyncadd [#allocation3], 4294967264 }
 0x20d   :  { %124 = vsyncpa [#allocation3], 1 }

</bundles_post_ra>
